<compile_context>
chip_gen: v6e
topology: v6e:2x2x1
jax: 0.10.0
libtpu: 0.0.40
codegen_flags: <defaults>
</compile_context>

<pallas_src>
import jax
import jax.numpy as jnp
from jax.experimental import pallas as pl
from jax.experimental.pallas import tpu as pltpu

EPS = 1e-5


def _make_kernel(H, W, G):
    HW = H * W

    def kernel(x_ref, t_ref, mask_ref, p1_ref, p2_ref, w1_ref, w2_ref, o_ref):
        Cin = x_ref.shape[1]
        Cout = o_ref.shape[1]

        def silu(v):
            return v * jax.nn.sigmoid(v)

        def group_norm(h2d, M, gamma, beta, inv_n):
            # h2d: (C, HW); M: (C, G) 0/1 group membership; gamma/beta: (C, 1)
            ch_sum = jnp.sum(h2d, axis=1, keepdims=True)            # (C, 1)
            ch_ssq = jnp.sum(h2d * h2d, axis=1, keepdims=True)      # (C, 1)
            g_sum = jnp.sum(ch_sum * M, axis=0, keepdims=True)      # (1, G)
            g_ssq = jnp.sum(ch_ssq * M, axis=0, keepdims=True)      # (1, G)
            g_mean = g_sum * inv_n
            g_var = jnp.maximum(g_ssq * inv_n - g_mean * g_mean, 0.0)
            g_rstd = jax.lax.rsqrt(g_var + EPS)
            c_mean = jnp.sum(M * g_mean, axis=1, keepdims=True)     # (C, 1)
            c_rstd = jnp.sum(M * g_rstd, axis=1, keepdims=True)     # (C, 1)
            return (h2d - c_mean) * (c_rstd * gamma) + beta

        masks = mask_ref[...]                                       # (16, HW), rows 0..8 valid

        def im2col_taps(h2d):
            # 9 shifted taps via XLU lane rotation + precomputed 0/1 border masks.
            cin = h2d.shape[0]
            per_tap_bf16 = (cin % 16) == 0      # bf16 tap fills whole (16,128) sublane tiles
            taps = []
            for ky in range(3):
                for kx in range(3):
                    idx = ky * 3 + kx
                    s = (ky - 1) * W + (kx - 1)                     # flat read offset
                    t = h2d if s == 0 else pltpu.roll(h2d, shift=(-s) % HW, axis=1)
                    if idx != 4:                                    # center tap: no mask
                        t = t * masks[idx:idx + 1]
                    taps.append(t.astype(jnp.bfloat16) if per_tap_bf16 else t)
            return taps, per_tap_bf16

        # packed per-channel params
        p1 = p1_ref[...]                                            # (Cin, 2+G)
        g1, be1, M1 = p1[:, 0:1], p1[:, 1:2], p1[:, 2:2 + G]
        p2 = p2_ref[...]                                            # (Cout, 3+G)
        g2, be2, b2, M2 = p2[:, 0:1], p2[:, 1:2], p2[:, 2:3], p2[:, 3:3 + G]

        x2d = x_ref[0]                                              # (Cin, HW) f32

        # ---- norm1 + SiLU + conv1 (bias folded into time-emb projection) ----
        h = silu(group_norm(x2d, M1, g1, be1, 1.0 / ((Cin // G) * HW)))
        taps, cast = im2col_taps(h)
        im1 = jnp.concatenate(taps, axis=0)                         # (9*Cin, HW)
        if not cast:
            im1 = im1.astype(jnp.bfloat16)
        h = jnp.dot(w1_ref[...], im1, preferred_element_type=jnp.float32)   # (Cout, HW)

        # ---- + time embedding (projection + b1 hoisted to wrapper) ----
        h = h + t_ref[0]                                            # (Cout, 1) broadcast

        # ---- norm2 + SiLU + conv2 (+ residual 1x1 folded as extra K rows) ----
        h = silu(group_norm(h, M2, g2, be2, 1.0 / ((Cout // G) * HW)))
        taps, cast = im2col_taps(h)
        if not cast:
            taps = [t.astype(jnp.bfloat16) for t in taps]
        taps.append(x2d.astype(jnp.bfloat16))                       # residual rows
        im2 = jnp.concatenate(taps, axis=0)                         # (9*Cout+Cin, HW)
        out = jnp.dot(w2_ref[...], im2, preferred_element_type=jnp.float32) + b2

        o_ref[...] = out.reshape(o_ref.shape)

    return kernel


def _tap_masks(H, W):
    # 0/1 validity masks for the 9 conv taps, packed as one 2-D (16, HW) array
    # (rows 9..15 pad to a full sublane tile; unused).
    HW = H * W
    yy, xx = jnp.meshgrid(jnp.arange(H), jnp.arange(W), indexing="ij")
    yy = yy.reshape(1, HW)
    xx = xx.reshape(1, HW)
    rows = []
    for ky in range(3):
        for kx in range(3):
            v = ((yy >= (1 if ky == 0 else 0)) & (yy <= (H - 2 if ky == 2 else H - 1))
                 & (xx >= (1 if kx == 0 else 0)) & (xx <= (W - 2 if kx == 2 else W - 1)))
            rows.append(v.astype(jnp.float32))
    m = jnp.concatenate(rows, axis=0)                               # (9, HW)
    pad = jnp.ones((16 - 9, HW), jnp.float32)
    return jnp.concatenate([m, pad], axis=0)                        # (16, HW)


def resnet_block_forward(x_nchw, t_emb, p):
    N, Cin, H, W = x_nchw.shape
    Cout, G = p["M2"].shape
    HW = H * W

    # lane-dense (C, HW) layout: free reshape from NCHW, no transposes.
    x_flat = x_nchw.reshape(N, Cin, HW).astype(jnp.float32)

    # hoisted time-embedding projection, with conv1 bias b1 folded in.
    t = t_emb.astype(jnp.float32)
    t_proj = (t * jax.nn.sigmoid(t)) @ p["wt"] + (p["bt"] + p["b1"])[None, :]
    t_proj = t_proj[:, :, None]                                     # (N, Cout, 1)

    tap_mask = _tap_masks(H, W)                                     # (16, HW)

    # packed per-channel params (one input per channel count instead of 7+).
    col = lambda a: a.reshape(-1, 1)
    p1 = jnp.concatenate([col(p["g1"]), col(p["be1"]), p["M1"]], axis=1)         # (Cin, 2+G)
    p2 = jnp.concatenate([col(p["g2"]), col(p["be2"]), col(p["b2"] + p["br"]),
                          p["M2"]], axis=1)                                      # (Cout, 3+G)

    ordered = [x_flat, t_proj, tap_mask, p1, p2, p["w1p"], p["w2p_ext"]]

    def batched_spec(shape):
        nd = len(shape)
        return pl.BlockSpec((1,) + tuple(shape[1:]),
                            lambda n, _nd=nd: (n,) + (0,) * (_nd - 1))

    def full_spec(shape):
        nd = len(shape)
        return pl.BlockSpec(tuple(shape), lambda n, _nd=nd: (0,) * _nd)

    in_specs = [batched_spec(x_flat.shape), batched_spec(t_proj.shape)]
    in_specs += [full_spec(a.shape) for a in ordered[2:]]

    # TODO(synk): at UNet scale (large C/HW) add a row-block spatial grid axis
    # (1-row halo per conv) and single-buffered weight specs (pl.Buffered(1)) so
    # the bf16 im2col fits v7x's 64 MiB VMEM; also block B>1 images per grid
    # step on single-TC v5e/v6e while keeping >=2 "parallel" steps for v7x.
    out = pl.pallas_call(
        _make_kernel(H, W, G),
        out_shape=jax.ShapeDtypeStruct((N, Cout, HW), jnp.float32),
        grid_spec=pltpu.PrefetchScalarGridSpec(
            num_scalar_prefetch=0,
            grid=(N,),
            in_specs=in_specs,
            out_specs=batched_spec((N, Cout, HW)),
        ),
        compiler_params=pltpu.CompilerParams(
            dimension_semantics=("parallel",),   # batch steps independent -> both TCs on v7x
            vmem_limit_bytes=32 * 1024 * 1024,
        ),
    )(*ordered)
    return out.reshape(N, Cout, H, W)                               # NCHW, no transpose


def make_params(key, Cin, Cout, T, G):
    ks = jax.random.split(key, 12)

    def n(k, shape, s=0.1):
        return s * jax.random.normal(k, shape, jnp.float32)

    w1_oihw = n(ks[0], (Cout, Cin, 3, 3))
    w2_oihw = n(ks[1], (Cout, Cout, 3, 3))
    wr_oihw = n(ks[2], (Cout, Cin, 1, 1))
    w_lin = n(ks[3], (Cout, T))                                     # nn.Linear weight
    p = dict(
        g1=1.0 + n(ks[4], (Cin,)), be1=n(ks[5], (Cin,)),
        g2=1.0 + n(ks[6], (Cout,)), be2=n(ks[7], (Cout,)),
        b1=n(ks[8], (Cout,)), b2=n(ks[9], (Cout,)),
        br=n(ks[10], (Cout,)), bt=n(ks[11], (Cout,)),
        w1_oihw=w1_oihw, w2_oihw=w2_oihw, wr_oihw=wr_oihw, w_lin=w_lin,
    )
    # kernel layouts: im2col-packed bf16 conv weights (f32 accumulation in-kernel);
    # residual 1x1 weights appended as extra columns of conv2 (K = 9*Cout + Cin).
    p["w1p"] = jnp.transpose(w1_oihw, (0, 2, 3, 1)).reshape(Cout, 9 * Cin).astype(jnp.bfloat16)
    w2p = jnp.transpose(w2_oihw, (0, 2, 3, 1)).reshape(Cout, 9 * Cout)
    wr = wr_oihw[:, :, 0, 0]
    p["w2p_ext"] = jnp.concatenate([w2p, wr], axis=1).astype(jnp.bfloat16)
    p["wt"] = jnp.transpose(w_lin, (1, 0))

    def memb(C):                                                    # (C, G) 0/1 membership
        return (jnp.arange(C)[:, None] // (C // G)
                == jnp.arange(G)[None, :]).astype(jnp.float32)

    p["M1"] = memb(Cin)
    p["M2"] = memb(Cout)
    return p


def reference(x, t_emb, p, G):
    def silu(v):
        return v * jax.nn.sigmoid(v)

    def gn(h, gamma, beta):
        N, C, H, W = h.shape
        hr = h.reshape(N, G, -1)
        mean = hr.mean(axis=2, keepdims=True)
        var = hr.var(axis=2, keepdims=True)
        hn = ((hr - mean) / jnp.sqrt(var + EPS)).reshape(N, C, H, W)
        return hn * gamma.reshape(1, C, 1, 1) + beta.reshape(1, C, 1, 1)

    def conv(h, w, b, pad):
        y = jax.lax.conv_general_dilated(h, w, (1, 1), [(pad, pad), (pad, pad)],
                                         dimension_numbers=("NCHW", "OIHW", "NCHW"))
        return y + b.reshape(1, -1, 1, 1)

    h = silu(gn(x, p["g1"], p["be1"]))
    h = conv(h, p["w1_oihw"], p["b1"], 1)
    t_proj = silu(t_emb) @ p["w_lin"].T + p["bt"]
    h = h + t_proj[:, :, None, None]
    h = silu(gn(h, p["g2"], p["be2"]))
    h = conv(h, p["w2_oihw"], p["b2"], 1)
    res = conv(x, p["wr_oihw"], p["br"], 0)
    return h + res


if __name__ == "__main__":
    # ResnetBlock(in_channels=8, out_channels=16, time_emb_dim=32, groups=4);
    # x is NCHW like PyTorch.  H*W = 256 keeps the lane axis dense.
    N, Cin, Cout, H, W, T, G = 2, 8, 16, 16, 16, 32, 4
    key = jax.random.PRNGKey(0)
    kx, kt, kp = jax.random.split(key, 3)
    x = jax.random.normal(kx, (N, Cin, H, W), jnp.float32)
    t_emb = jax.random.normal(kt, (N, T), jnp.float32)
    params = make_params(kp, Cin, Cout, T, G)

    out = jax.block_until_ready(resnet_block_forward(x, t_emb, params))
    ref = jax.block_until_ready(reference(x, t_emb, params, G))

    assert out.shape == (N, Cout, H, W)
    # Tolerance vs the f32 reference: bf16 matmul operands, longest contraction
    # K = 9*Cout + Cin = 152 -> expected max abs error O(1e-2), inside 5e-2.
    err = float(jnp.max(jnp.abs(out - ref)))
    assert err < 5e-2, f"max abs error too large: {err}"
    print("KERNEL_OK")
</pallas_src>

<mosaic_0001>
module attributes {stable_mosaic.version = 11 : i64} {
  func.func @kernel(%arg0: i32, %arg1: memref<1x8x256xf32, #tpu.memory_space<vmem>>, %arg2: memref<1x16x1xf32, #tpu.memory_space<vmem>>, %arg3: memref<16x256xf32, #tpu.memory_space<vmem>>, %arg4: memref<8x6xf32, #tpu.memory_space<vmem>>, %arg5: memref<16x7xf32, #tpu.memory_space<vmem>>, %arg6: memref<16x72xbf16, #tpu.memory_space<vmem>>, %arg7: memref<16x152xbf16, #tpu.memory_space<vmem>>, %arg8: memref<1x16x256xf32, #tpu.memory_space<vmem>>) attributes {dimension_semantics = [#tpu.dimension_semantics<parallel>], iteration_bounds = array<i64: 2>, scalar_prefetch = 0 : i64, scratch_operands = 0 : i64, tpu.core_type = #tpu.core_type<tc>, window_params = [{transform_indices = @transform_0, window_bounds = array<i64: 1, 8, 256>}, {transform_indices = @transform_1, window_bounds = array<i64: 1, 16, 1>}, {pipeline_mode = #tpu.pipeline_mode<synchronous>, transform_indices = @transform_2, window_bounds = array<i64: 16, 256>}, {pipeline_mode = #tpu.pipeline_mode<synchronous>, transform_indices = @transform_3, window_bounds = array<i64: 8, 6>}, {pipeline_mode = #tpu.pipeline_mode<synchronous>, transform_indices = @transform_4, window_bounds = array<i64: 16, 7>}, {pipeline_mode = #tpu.pipeline_mode<synchronous>, transform_indices = @transform_5, window_bounds = array<i64: 16, 72>}, {pipeline_mode = #tpu.pipeline_mode<synchronous>, transform_indices = @transform_6, window_bounds = array<i64: 16, 152>}, {transform_indices = @transform_7, window_bounds = array<i64: 1, 16, 256>}]} {
    %c0 = arith.constant 0 : index
    %c0_0 = arith.constant 0 : index
    %0 = vector.load %arg3[%c0, %c0_0] : memref<16x256xf32, #tpu.memory_space<vmem>>, vector<16x256xf32>
    %c0_1 = arith.constant 0 : index
    %c0_2 = arith.constant 0 : index
    %1 = vector.load %arg4[%c0_1, %c0_2] : memref<8x6xf32, #tpu.memory_space<vmem>>, vector<8x6xf32>
    %2 = vector.extract_strided_slice %1 {offsets = [0, 0], sizes = [8, 1], strides = [1, 1]} : vector<8x6xf32> to vector<8x1xf32>
    %3 = vector.extract_strided_slice %1 {offsets = [0, 1], sizes = [8, 1], strides = [1, 1]} : vector<8x6xf32> to vector<8x1xf32>
    %4 = vector.extract_strided_slice %1 {offsets = [0, 2], sizes = [8, 4], strides = [1, 1]} : vector<8x6xf32> to vector<8x4xf32>
    %c0_3 = arith.constant 0 : index
    %c0_4 = arith.constant 0 : index
    %5 = vector.load %arg5[%c0_3, %c0_4] : memref<16x7xf32, #tpu.memory_space<vmem>>, vector<16x7xf32>
    %6 = vector.extract_strided_slice %5 {offsets = [0, 0], sizes = [16, 1], strides = [1, 1]} : vector<16x7xf32> to vector<16x1xf32>
    %7 = vector.extract_strided_slice %5 {offsets = [0, 1], sizes = [16, 1], strides = [1, 1]} : vector<16x7xf32> to vector<16x1xf32>
    %8 = vector.extract_strided_slice %5 {offsets = [0, 2], sizes = [16, 1], strides = [1, 1]} : vector<16x7xf32> to vector<16x1xf32>
    %9 = vector.extract_strided_slice %5 {offsets = [0, 3], sizes = [16, 4], strides = [1, 1]} : vector<16x7xf32> to vector<16x4xf32>
    %c0_5 = arith.constant 0 : index
    %c0_6 = arith.constant 0 : index
    %c0_7 = arith.constant 0 : index
    %10 = vector.load %arg1[%c0_5, %c0_6, %c0_7] : memref<1x8x256xf32, #tpu.memory_space<vmem>>, vector<1x8x256xf32>
    %11 = vector.shape_cast %10 : vector<1x8x256xf32> to vector<8x256xf32>
    %cst = arith.constant dense<0.000000e+00> : vector<8xf32>
    %12 = vector.multi_reduction <add>, %11, %cst [1] : vector<8x256xf32> to vector<8xf32>
    %13 = vector.shape_cast %12 : vector<8xf32> to vector<8x1xf32>
    %14 = arith.mulf %11, %11 : vector<8x256xf32>
    %cst_8 = arith.constant dense<0.000000e+00> : vector<8xf32>
    %15 = vector.multi_reduction <add>, %14, %cst_8 [1] : vector<8x256xf32> to vector<8xf32>
    %16 = vector.shape_cast %15 : vector<8xf32> to vector<8x1xf32>
    %17 = vector.broadcast %13 : vector<8x1xf32> to vector<8x4xf32>
    %18 = arith.mulf %17, %4 : vector<8x4xf32>
    %cst_9 = arith.constant dense<0.000000e+00> : vector<4xf32>
    %19 = vector.multi_reduction <add>, %18, %cst_9 [0] : vector<8x4xf32> to vector<4xf32>
    %20 = vector.shape_cast %19 : vector<4xf32> to vector<1x4xf32>
    %21 = vector.broadcast %16 : vector<8x1xf32> to vector<8x4xf32>
    %22 = arith.mulf %21, %4 : vector<8x4xf32>
    %cst_10 = arith.constant dense<0.000000e+00> : vector<4xf32>
    %23 = vector.multi_reduction <add>, %22, %cst_10 [0] : vector<8x4xf32> to vector<4xf32>
    %24 = vector.shape_cast %23 : vector<4xf32> to vector<1x4xf32>
    %cst_11 = arith.constant 0.001953125 : f32
    %25 = vector.broadcast %cst_11 : f32 to vector<1x4xf32>
    %26 = arith.mulf %20, %25 : vector<1x4xf32>
    %cst_12 = arith.constant 0.001953125 : f32
    %27 = vector.broadcast %cst_12 : f32 to vector<1x4xf32>
    %28 = arith.mulf %24, %27 : vector<1x4xf32>
    %29 = arith.mulf %26, %26 : vector<1x4xf32>
    %30 = arith.subf %28, %29 : vector<1x4xf32>
    %cst_13 = arith.constant 0.000000e+00 : f32
    %31 = vector.broadcast %cst_13 : f32 to vector<1x4xf32>
    %32 = arith.maximumf %30, %31 : vector<1x4xf32>
    %cst_14 = arith.constant 9.99999974E-6 : f32
    %33 = vector.broadcast %cst_14 : f32 to vector<1x4xf32>
    %34 = arith.addf %32, %33 : vector<1x4xf32>
    %35 = math.rsqrt %34 : vector<1x4xf32>
    %36 = vector.broadcast %26 : vector<1x4xf32> to vector<8x4xf32>
    %37 = arith.mulf %4, %36 : vector<8x4xf32>
    %cst_15 = arith.constant dense<0.000000e+00> : vector<8xf32>
    %38 = vector.multi_reduction <add>, %37, %cst_15 [1] : vector<8x4xf32> to vector<8xf32>
    %39 = vector.shape_cast %38 : vector<8xf32> to vector<8x1xf32>
    %40 = vector.broadcast %35 : vector<1x4xf32> to vector<8x4xf32>
    %41 = arith.mulf %4, %40 : vector<8x4xf32>
    %cst_16 = arith.constant dense<0.000000e+00> : vector<8xf32>
    %42 = vector.multi_reduction <add>, %41, %cst_16 [1] : vector<8x4xf32> to vector<8xf32>
    %43 = vector.shape_cast %42 : vector<8xf32> to vector<8x1xf32>
    %44 = vector.broadcast %39 : vector<8x1xf32> to vector<8x256xf32>
    %45 = arith.subf %11, %44 : vector<8x256xf32>
    %46 = arith.mulf %43, %2 : vector<8x1xf32>
    %47 = vector.broadcast %46 : vector<8x1xf32> to vector<8x256xf32>
    %48 = arith.mulf %45, %47 : vector<8x256xf32>
    %49 = vector.broadcast %3 : vector<8x1xf32> to vector<8x256xf32>
    %50 = arith.addf %48, %49 : vector<8x256xf32>
    %51 = arith.negf %50 : vector<8x256xf32>
    %52 = math.exp %51 : vector<8x256xf32>
    %cst_17 = arith.constant 1.000000e+00 : f32
    %53 = vector.broadcast %cst_17 : f32 to vector<8x256xf32>
    %54 = arith.addf %53, %52 : vector<8x256xf32>
    %55 = arith.divf %53, %54 : vector<8x256xf32>
    %56 = arith.mulf %50, %55 : vector<8x256xf32>
    %c17_i32 = arith.constant 17 : i32
    %57 = tpu.dynamic_rotate %56 by %c17_i32 dim 1 : vector<8x256xf32>, i32 -> vector<8x256xf32>
    %58 = vector.extract_strided_slice %0 {offsets = [0, 0], sizes = [1, 256], strides = [1, 1]} : vector<16x256xf32> to vector<1x256xf32>
    %59 = vector.broadcast %58 : vector<1x256xf32> to vector<8x256xf32>
    %60 = arith.mulf %57, %59 : vector<8x256xf32>
    %c16_i32 = arith.constant 16 : i32
    %61 = tpu.dynamic_rotate %56 by %c16_i32 dim 1 : vector<8x256xf32>, i32 -> vector<8x256xf32>
    %62 = vector.extract_strided_slice %0 {offsets = [1, 0], sizes = [1, 256], strides = [1, 1]} : vector<16x256xf32> to vector<1x256xf32>
    %63 = vector.broadcast %62 : vector<1x256xf32> to vector<8x256xf32>
    %64 = arith.mulf %61, %63 : vector<8x256xf32>
    %c15_i32 = arith.constant 15 : i32
    %65 = tpu.dynamic_rotate %56 by %c15_i32 dim 1 : vector<8x256xf32>, i32 -> vector<8x256xf32>
    %66 = vector.extract_strided_slice %0 {offsets = [2, 0], sizes = [1, 256], strides = [1, 1]} : vector<16x256xf32> to vector<1x256xf32>
    %67 = vector.broadcast %66 : vector<1x256xf32> to vector<8x256xf32>
    %68 = arith.mulf %65, %67 : vector<8x256xf32>
    %c1_i32 = arith.constant 1 : i32
    %69 = tpu.dynamic_rotate %56 by %c1_i32 dim 1 : vector<8x256xf32>, i32 -> vector<8x256xf32>
    %70 = vector.extract_strided_slice %0 {offsets = [3, 0], sizes = [1, 256], strides = [1, 1]} : vector<16x256xf32> to vector<1x256xf32>
    %71 = vector.broadcast %70 : vector<1x256xf32> to vector<8x256xf32>
    %72 = arith.mulf %69, %71 : vector<8x256xf32>
    %c255_i32 = arith.constant 255 : i32
    %73 = tpu.dynamic_rotate %56 by %c255_i32 dim 1 : vector<8x256xf32>, i32 -> vector<8x256xf32>
    %74 = vector.extract_strided_slice %0 {offsets = [5, 0], sizes = [1, 256], strides = [1, 1]} : vector<16x256xf32> to vector<1x256xf32>
    %75 = vector.broadcast %74 : vector<1x256xf32> to vector<8x256xf32>
    %76 = arith.mulf %73, %75 : vector<8x256xf32>
    %c241_i32 = arith.constant 241 : i32
    %77 = tpu.dynamic_rotate %56 by %c241_i32 dim 1 : vector<8x256xf32>, i32 -> vector<8x256xf32>
    %78 = vector.extract_strided_slice %0 {offsets = [6, 0], sizes = [1, 256], strides = [1, 1]} : vector<16x256xf32> to vector<1x256xf32>
    %79 = vector.broadcast %78 : vector<1x256xf32> to vector<8x256xf32>
    %80 = arith.mulf %77, %79 : vector<8x256xf32>
    %c240_i32 = arith.constant 240 : i32
    %81 = tpu.dynamic_rotate %56 by %c240_i32 dim 1 : vector<8x256xf32>, i32 -> vector<8x256xf32>
    %82 = vector.extract_strided_slice %0 {offsets = [7, 0], sizes = [1, 256], strides = [1, 1]} : vector<16x256xf32> to vector<1x256xf32>
    %83 = vector.broadcast %82 : vector<1x256xf32> to vector<8x256xf32>
    %84 = arith.mulf %81, %83 : vector<8x256xf32>
    %c239_i32 = arith.constant 239 : i32
    %85 = tpu.dynamic_rotate %56 by %c239_i32 dim 1 : vector<8x256xf32>, i32 -> vector<8x256xf32>
    %86 = vector.extract_strided_slice %0 {offsets = [8, 0], sizes = [1, 256], strides = [1, 1]} : vector<16x256xf32> to vector<1x256xf32>
    %87 = vector.broadcast %86 : vector<1x256xf32> to vector<8x256xf32>
    %88 = arith.mulf %85, %87 : vector<8x256xf32>
    %89 = tpu.concatenate %60, %64, %68, %72, %56, %76, %80, %84, %88 in 0 : vector<8x256xf32>, vector<8x256xf32>, vector<8x256xf32>, vector<8x256xf32>, vector<8x256xf32>, vector<8x256xf32>, vector<8x256xf32>, vector<8x256xf32>, vector<8x256xf32> -> vector<72x256xf32>
    %90 = arith.truncf %89 : vector<72x256xf32> to vector<72x256xbf16>
    %c0_18 = arith.constant 0 : index
    %c0_19 = arith.constant 0 : index
    %91 = vector.load %arg6[%c0_18, %c0_19] : memref<16x72xbf16, #tpu.memory_space<vmem>>, vector<16x72xbf16>
    %cst_20 = arith.constant dense<0.000000e+00> : vector<16x256xf32>
    %92 = tpu.matmul %91, %90, %cst_20 {dimension_numbers = #tpu.dot_dimension_numbers<[1], [0], [0], [1], [0, 0, 1, 1], [], []>} : vector<16x72xbf16>, vector<72x256xbf16>, vector<16x256xf32> -> vector<16x256xf32>
    %c0_21 = arith.constant 0 : index
    %c0_22 = arith.constant 0 : index
    %c0_23 = arith.constant 0 : index
    %93 = vector.load %arg2[%c0_21, %c0_22, %c0_23] : memref<1x16x1xf32, #tpu.memory_space<vmem>>, vector<1x16x1xf32>
    %94 = vector.shape_cast %93 : vector<1x16x1xf32> to vector<16x1xf32>
    %95 = vector.broadcast %94 : vector<16x1xf32> to vector<16x256xf32>
    %96 = arith.addf %92, %95 : vector<16x256xf32>
    %cst_24 = arith.constant dense<0.000000e+00> : vector<16xf32>
    %97 = vector.multi_reduction <add>, %96, %cst_24 [1] : vector<16x256xf32> to vector<16xf32>
    %98 = vector.shape_cast %97 : vector<16xf32> to vector<16x1xf32>
    %99 = arith.mulf %96, %96 : vector<16x256xf32>
    %cst_25 = arith.constant dense<0.000000e+00> : vector<16xf32>
    %100 = vector.multi_reduction <add>, %99, %cst_25 [1] : vector<16x256xf32> to vector<16xf32>
    %101 = vector.shape_cast %100 : vector<16xf32> to vector<16x1xf32>
    %102 = vector.broadcast %98 : vector<16x1xf32> to vector<16x4xf32>
    %103 = arith.mulf %102, %9 : vector<16x4xf32>
    %cst_26 = arith.constant dense<0.000000e+00> : vector<4xf32>
    %104 = vector.multi_reduction <add>, %103, %cst_26 [0] : vector<16x4xf32> to vector<4xf32>
    %105 = vector.shape_cast %104 : vector<4xf32> to vector<1x4xf32>
    %106 = vector.broadcast %101 : vector<16x1xf32> to vector<16x4xf32>
    %107 = arith.mulf %106, %9 : vector<16x4xf32>
    %cst_27 = arith.constant dense<0.000000e+00> : vector<4xf32>
    %108 = vector.multi_reduction <add>, %107, %cst_27 [0] : vector<16x4xf32> to vector<4xf32>
    %109 = vector.shape_cast %108 : vector<4xf32> to vector<1x4xf32>
    %cst_28 = arith.constant 9.765625E-4 : f32
    %110 = vector.broadcast %cst_28 : f32 to vector<1x4xf32>
    %111 = arith.mulf %105, %110 : vector<1x4xf32>
    %cst_29 = arith.constant 9.765625E-4 : f32
    %112 = vector.broadcast %cst_29 : f32 to vector<1x4xf32>
    %113 = arith.mulf %109, %112 : vector<1x4xf32>
    %114 = arith.mulf %111, %111 : vector<1x4xf32>
    %115 = arith.subf %113, %114 : vector<1x4xf32>
    %cst_30 = arith.constant 0.000000e+00 : f32
    %116 = vector.broadcast %cst_30 : f32 to vector<1x4xf32>
    %117 = arith.maximumf %115, %116 : vector<1x4xf32>
    %cst_31 = arith.constant 9.99999974E-6 : f32
    %118 = vector.broadcast %cst_31 : f32 to vector<1x4xf32>
    %119 = arith.addf %117, %118 : vector<1x4xf32>
    %120 = math.rsqrt %119 : vector<1x4xf32>
    %121 = vector.broadcast %111 : vector<1x4xf32> to vector<16x4xf32>
    %122 = arith.mulf %9, %121 : vector<16x4xf32>
    %cst_32 = arith.constant dense<0.000000e+00> : vector<16xf32>
    %123 = vector.multi_reduction <add>, %122, %cst_32 [1] : vector<16x4xf32> to vector<16xf32>
    %124 = vector.shape_cast %123 : vector<16xf32> to vector<16x1xf32>
    %125 = vector.broadcast %120 : vector<1x4xf32> to vector<16x4xf32>
    %126 = arith.mulf %9, %125 : vector<16x4xf32>
    %cst_33 = arith.constant dense<0.000000e+00> : vector<16xf32>
    %127 = vector.multi_reduction <add>, %126, %cst_33 [1] : vector<16x4xf32> to vector<16xf32>
    %128 = vector.shape_cast %127 : vector<16xf32> to vector<16x1xf32>
    %129 = vector.broadcast %124 : vector<16x1xf32> to vector<16x256xf32>
    %130 = arith.subf %96, %129 : vector<16x256xf32>
    %131 = arith.mulf %128, %6 : vector<16x1xf32>
    %132 = vector.broadcast %131 : vector<16x1xf32> to vector<16x256xf32>
    %133 = arith.mulf %130, %132 : vector<16x256xf32>
    %134 = vector.broadcast %7 : vector<16x1xf32> to vector<16x256xf32>
    %135 = arith.addf %133, %134 : vector<16x256xf32>
    %136 = arith.negf %135 : vector<16x256xf32>
    %137 = math.exp %136 : vector<16x256xf32>
    %cst_34 = arith.constant 1.000000e+00 : f32
    %138 = vector.broadcast %cst_34 : f32 to vector<16x256xf32>
    %139 = arith.addf %138, %137 : vector<16x256xf32>
    %140 = arith.divf %138, %139 : vector<16x256xf32>
    %141 = arith.mulf %135, %140 : vector<16x256xf32>
    %c17_i32_35 = arith.constant 17 : i32
    %142 = tpu.dynamic_rotate %141 by %c17_i32_35 dim 1 : vector<16x256xf32>, i32 -> vector<16x256xf32>
    %143 = vector.extract_strided_slice %0 {offsets = [0, 0], sizes = [1, 256], strides = [1, 1]} : vector<16x256xf32> to vector<1x256xf32>
    %144 = vector.broadcast %143 : vector<1x256xf32> to vector<16x256xf32>
    %145 = arith.mulf %142, %144 : vector<16x256xf32>
    %146 = arith.truncf %145 : vector<16x256xf32> to vector<16x256xbf16>
    %c16_i32_36 = arith.constant 16 : i32
    %147 = tpu.dynamic_rotate %141 by %c16_i32_36 dim 1 : vector<16x256xf32>, i32 -> vector<16x256xf32>
    %148 = vector.extract_strided_slice %0 {offsets = [1, 0], sizes = [1, 256], strides = [1, 1]} : vector<16x256xf32> to vector<1x256xf32>
    %149 = vector.broadcast %148 : vector<1x256xf32> to vector<16x256xf32>
    %150 = arith.mulf %147, %149 : vector<16x256xf32>
    %151 = arith.truncf %150 : vector<16x256xf32> to vector<16x256xbf16>
    %c15_i32_37 = arith.constant 15 : i32
    %152 = tpu.dynamic_rotate %141 by %c15_i32_37 dim 1 : vector<16x256xf32>, i32 -> vector<16x256xf32>
    %153 = vector.extract_strided_slice %0 {offsets = [2, 0], sizes = [1, 256], strides = [1, 1]} : vector<16x256xf32> to vector<1x256xf32>
    %154 = vector.broadcast %153 : vector<1x256xf32> to vector<16x256xf32>
    %155 = arith.mulf %152, %154 : vector<16x256xf32>
    %156 = arith.truncf %155 : vector<16x256xf32> to vector<16x256xbf16>
    %c1_i32_38 = arith.constant 1 : i32
    %157 = tpu.dynamic_rotate %141 by %c1_i32_38 dim 1 : vector<16x256xf32>, i32 -> vector<16x256xf32>
    %158 = vector.extract_strided_slice %0 {offsets = [3, 0], sizes = [1, 256], strides = [1, 1]} : vector<16x256xf32> to vector<1x256xf32>
    %159 = vector.broadcast %158 : vector<1x256xf32> to vector<16x256xf32>
    %160 = arith.mulf %157, %159 : vector<16x256xf32>
    %161 = arith.truncf %160 : vector<16x256xf32> to vector<16x256xbf16>
    %162 = arith.truncf %141 : vector<16x256xf32> to vector<16x256xbf16>
    %c255_i32_39 = arith.constant 255 : i32
    %163 = tpu.dynamic_rotate %141 by %c255_i32_39 dim 1 : vector<16x256xf32>, i32 -> vector<16x256xf32>
    %164 = vector.extract_strided_slice %0 {offsets = [5, 0], sizes = [1, 256], strides = [1, 1]} : vector<16x256xf32> to vector<1x256xf32>
    %165 = vector.broadcast %164 : vector<1x256xf32> to vector<16x256xf32>
    %166 = arith.mulf %163, %165 : vector<16x256xf32>
    %167 = arith.truncf %166 : vector<16x256xf32> to vector<16x256xbf16>
    %c241_i32_40 = arith.constant 241 : i32
    %168 = tpu.dynamic_rotate %141 by %c241_i32_40 dim 1 : vector<16x256xf32>, i32 -> vector<16x256xf32>
    %169 = vector.extract_strided_slice %0 {offsets = [6, 0], sizes = [1, 256], strides = [1, 1]} : vector<16x256xf32> to vector<1x256xf32>
    %170 = vector.broadcast %169 : vector<1x256xf32> to vector<16x256xf32>
    %171 = arith.mulf %168, %170 : vector<16x256xf32>
    %172 = arith.truncf %171 : vector<16x256xf32> to vector<16x256xbf16>
    %c240_i32_41 = arith.constant 240 : i32
    %173 = tpu.dynamic_rotate %141 by %c240_i32_41 dim 1 : vector<16x256xf32>, i32 -> vector<16x256xf32>
    %174 = vector.extract_strided_slice %0 {offsets = [7, 0], sizes = [1, 256], strides = [1, 1]} : vector<16x256xf32> to vector<1x256xf32>
    %175 = vector.broadcast %174 : vector<1x256xf32> to vector<16x256xf32>
    %176 = arith.mulf %173, %175 : vector<16x256xf32>
    %177 = arith.truncf %176 : vector<16x256xf32> to vector<16x256xbf16>
    %c239_i32_42 = arith.constant 239 : i32
    %178 = tpu.dynamic_rotate %141 by %c239_i32_42 dim 1 : vector<16x256xf32>, i32 -> vector<16x256xf32>
    %179 = vector.extract_strided_slice %0 {offsets = [8, 0], sizes = [1, 256], strides = [1, 1]} : vector<16x256xf32> to vector<1x256xf32>
    %180 = vector.broadcast %179 : vector<1x256xf32> to vector<16x256xf32>
    %181 = arith.mulf %178, %180 : vector<16x256xf32>
    %182 = arith.truncf %181 : vector<16x256xf32> to vector<16x256xbf16>
    %183 = arith.truncf %11 : vector<8x256xf32> to vector<8x256xbf16>
    %184 = tpu.concatenate %146, %151, %156, %161, %162, %167, %172, %177, %182, %183 in 0 : vector<16x256xbf16>, vector<16x256xbf16>, vector<16x256xbf16>, vector<16x256xbf16>, vector<16x256xbf16>, vector<16x256xbf16>, vector<16x256xbf16>, vector<16x256xbf16>, vector<16x256xbf16>, vector<8x256xbf16> -> vector<152x256xbf16>
    %c0_43 = arith.constant 0 : index
    %c0_44 = arith.constant 0 : index
    %185 = vector.load %arg7[%c0_43, %c0_44] : memref<16x152xbf16, #tpu.memory_space<vmem>>, vector<16x152xbf16>
    %cst_45 = arith.constant dense<0.000000e+00> : vector<16x256xf32>
    %186 = tpu.matmul %185, %184, %cst_45 {dimension_numbers = #tpu.dot_dimension_numbers<[1], [0], [0], [1], [0, 0, 1, 1], [], []>} : vector<16x152xbf16>, vector<152x256xbf16>, vector<16x256xf32> -> vector<16x256xf32>
    %187 = vector.broadcast %8 : vector<16x1xf32> to vector<16x256xf32>
    %188 = arith.addf %186, %187 : vector<16x256xf32>
    %189 = vector.shape_cast %188 : vector<16x256xf32> to vector<1x16x256xf32>
    %c0_46 = arith.constant 0 : index
    %c0_47 = arith.constant 0 : index
    %c0_48 = arith.constant 0 : index
    %190 = vector.load %arg8[%c0_46, %c0_47, %c0_48] : memref<1x16x256xf32, #tpu.memory_space<vmem>>, vector<1x16x256xf32>
    tpu.vector_store %arg8[%c0_46, %c0_47, %c0_48], %189 {strides = array<i32>} : memref<1x16x256xf32, #tpu.memory_space<vmem>>, vector<1x16x256xf32>,
    return
  }
  func.func @transform_0(%arg0: i32) -> (i32, i32, i32) {
    %c0_i32 = arith.constant 0 : i32
    %c0_i32_0 = arith.constant 0 : i32
    %c0_i32_1 = arith.constant 0 : i32
    return %arg0, %c0_i32, %c0_i32_0 : i32, i32, i32
  }
  func.func @transform_1(%arg0: i32) -> (i32, i32, i32) {
    %c0_i32 = arith.constant 0 : i32
    %c0_i32_0 = arith.constant 0 : i32
    %c0_i32_1 = arith.constant 0 : i32
    return %arg0, %c0_i32, %c0_i32_0 : i32, i32, i32
  }
  func.func @transform_2(%arg0: i32) -> (i32, i32) {
    %c0_i32 = arith.constant 0 : i32
    %c0_i32_0 = arith.constant 0 : i32
    %c0_i32_1 = arith.constant 0 : i32
    return %c0_i32, %c0_i32_0 : i32, i32
  }
  func.func @transform_3(%arg0: i32) -> (i32, i32) {
    %c0_i32 = arith.constant 0 : i32
    %c0_i32_0 = arith.constant 0 : i32
    %c0_i32_1 = arith.constant 0 : i32
    return %c0_i32, %c0_i32_0 : i32, i32
  }
  func.func @transform_4(%arg0: i32) -> (i32, i32) {
    %c0_i32 = arith.constant 0 : i32
    %c0_i32_0 = arith.constant 0 : i32
    %c0_i32_1 = arith.constant 0 : i32
    return %c0_i32, %c0_i32_0 : i32, i32
  }
  func.func @transform_5(%arg0: i32) -> (i32, i32) {
    %c0_i32 = arith.constant 0 : i32
    %c0_i32_0 = arith.constant 0 : i32
    %c0_i32_1 = arith.constant 0 : i32
    return %c0_i32, %c0_i32_0 : i32, i32
  }
  func.func @transform_6(%arg0: i32) -> (i32, i32) {
    %c0_i32 = arith.constant 0 : i32
    %c0_i32_0 = arith.constant 0 : i32
    %c0_i32_1 = arith.constant 0 : i32
    return %c0_i32, %c0_i32_0 : i32, i32
  }
  func.func @transform_7(%arg0: i32) -> (i32, i32, i32) {
    %c0_i32 = arith.constant 0 : i32
    %c0_i32_0 = arith.constant 0 : i32
    %c0_i32_1 = arith.constant 0 : i32
    return %arg0, %c0_i32, %c0_i32_0 : i32, i32, i32
  }
}

</mosaic_0001>

<bundles_post_ra>
// kernel: tpu_custom_call.1
= control target key start
LH: loop header
LB: loop body
LE: loop exit
PB: predicated region body
PF: predicated region fallthrough
CT: control target
= control target key end

     0   :  { %12 = vsyncpa [#allocation3], 0  ;;  %s1936_s0 = inlined_call_operand.vmem [shape: f32[2,8,256], index: 0, kind: input, shape index: {}]   ;;  %s1937_s1 = inlined_call_operand.vmem [shape: f32[2,16,1], index: 1, kind: input, shape index: {}]   ;;  %s1938_s2 = inlined_call_operand.hbm [shape: f32[16,256], index: 2, kind: input, shape index: {}]   ;;  %s1939_s3 = inlined_call_operand.vmem [shape: f32[8,6], index: 3, kind: input, shape index: {}]   ;;  %s1940_s4 = inlined_call_operand.vmem [shape: f32[16,7], index: 4, kind: input, shape index: {}]   ;;  %s1941_s5 = inlined_call_operand.vmem [shape: bf16[16,72], index: 5, kind: input, shape index: {}]   ;;  %s1942_s6 = inlined_call_operand.vmem [shape: bf16[16,152], index: 6, kind: input, shape index: {}]   ;;  %s1943_s7 = inlined_call_operand.hbm [shape: f32[2,16,256], index: 7, kind: output, shape index: {}]  }
   0x1   :  { %13 = vsyncpa [#allocation4], 0 }
   0x2   :  { %15 = vsyncpa [#allocation4 + $0x1], 0  ;;  %s1376_s24 = smov 0   ;;  %s1378_s25 = smov 0  }
   0x3   :  { %s1380_s26 = smov 0   ;;  %s1382_s27 = smov 0  }
   0x4 LB: > { %s1397_s28 = sadd.s32 4294967295, %s1316_s27   ;;  %s1087_s29 = sadd.s32 4294967294, %s1316_s27   ;;  %s1316_s27 = sphi %s1382_s27, %s1951_s27   ;;  %s1312_s26 = sphi %s1380_s26, %s1950_s26   ;;  %s1308_s25 = sphi %s1378_s25, %s1949_s25   ;;  %s1304_s24 = sphi %s1376_s24, %s1948_s24  }
   0x5   : > { %s1401_s30 = sadd.s32 1, %s1316_s27   ;;  %s185_s8 = sadd.s32 1, %s1312_s26 }
   0x6   : > { %s182_s9 = ssub.s32 %s1316_s27, %s1401_s30  ;;  %p195_p0 = scmp.ne.s32.totalorder %s1312_s26, %s1308_s25 }
   0x7   : > { %p183_p1 = scmp.eq.s32.totalorder %s182_s9, 0  ;;  %p196_p2 = scmp.eq.s32.totalorder %s1397_s28, 1 }
   0x8   : > { %p201_p3 = scmp.ne.s32.totalorder %s1308_s25, %s1304_s24  ;;  %p202_p4 = scmp.eq.s32.totalorder %s1087_s29, 1 }
   0x9   : > { %s1412_s10 = scalar_select %p183_p1, %s1312_s26, %s185_s8  }
   0xa   : > { %p1414_p5 = por %p196_p2, %p195_p0  ;;  %p1418_p6 = por %p202_p4, %p201_p3 }
   0xb   : > { %p1088_p7 = scmp.ge.s32.totalorder %s1316_s27, 1  ;;  %p209_p8 = scmp.lt.s32.totalorder %s1316_s27, 3 }
   0xc   : > { %s1945_s12 = scalar_select %p1418_p6, 1, 0 }
   0xd   : > { %p1133_p9 = scmp.eq.s32.totalorder %s1397_s28, 0  ;;  %p1425_p10 = pnand %p1088_p7, %p209_p8 }
   0xe   : > { %s1318_s14 = smov [#allocation2]  }
   0xf   : > { %s221_s15 = sshll.u32 %s1318_s14, 4  ;;  %p1125_p11 = pneg %p1425_p10  ;;  %s222_s15 = int_to_ptr.vmem [resolvable:$true] %s221_s15 }
  0x10   : > { %s1237_s16 = scalar_lea.vmem %s222_s15, 512  ;;  %p1245_p3 = scmp.lt.s32.totalorder %s222_s15, %s222_s15 }
  0x11   : > { %p1126_p12 = pnand %p1133_p9, %p1125_p11  ;;  %p1238_p0 = scmp.ne.s32.totalorder %s222_s15, %s1237_s16 }
  0x12   : > { %p1246_p4 = scmp.lt.s32.totalorder %s1237_s16, %s1237_s16 }
  0x13   : > { %p1228_p13 = pneg %p1126_p12 }
  0x14   : > { %p1247_p6 = por %p1246_p4, %p1245_p3 }
  0x15   : > { %p1240_p1 = pnand %p1238_p0, %p1228_p13 }
  0x17   : > { %p1241_p2 = pneg %p1240_p1 }
  0x19   : > { %p1248_p7 = pnand %p1247_p6, %p1241_p2 }
  0x1b   : > { %1251 = shalt.err (!%p1248_p7)
}
  0x1c   : > { %s1319_s17 = smov 256   ;;  %s1320_s18 = smov 16  }
  0x1d   : > { %1128 = dma.hbm_to_vmem [thread:$0]  (!%p1126_p12), %s1938_s2, 512, %s222_s15, [#allocation3], %s1319_s17, %s1319_s17, %s1320_s18  }
  0x1e   : > { %265 = sbr.rel (%p1425_p10) target bundleno = 2038 (0x7f6), region = 48 }
  0x23   : > { %1295 = dma.done.wait (%p1133_p9), [#allocation3], 512  }
  0x24   : > { %1297 = vsyncadd (%p1133_p9), [#allocation3], 4294966784  ;;  %p302_p8 = scmp.lt.s32.totalorder %s1397_s28, 1  ;;  %v317_v6 = vld [vmem:[%s1939_s3] sm:$0xff]  ;;  %vm331_vm0 = vcmask 48144   ;;  %s1321_s14 = smov 126   ;;  %v406_v63 = vlaneseq }
  0x25   : > { %vm359_vm1 = vcmask 31744   ;;  %v1322_v38 = vmov 0   ;;  %v1323_v41 = vmov 1   ;;  %s1324_s15 = smov 111   ;;  %s1325_s16 = smov 127   ;;  %vm573_vm3 = vcmask 1043456  }
  0x26   : > { %s1444_s21 = scalar_select %p302_p8, %s1397_s28, 1  ;;  %1185 = vset.pattern.permute.xlu1 %v1322_v38  ;;  %612 = vmatprep.mubr.bf16.mxu0 %v1322_v38  ;;  %vm569_vm11 = vcmask 588800   ;;  %vm641_vm12 = vcmask 56344   ;;  %vm930_vm13 = vcmask 195584  }
  0x27   : > { %1188 = vset.pattern.permute.xlu0 %v1322_v38  ;;  %s1326_s17 = smov 113   ;;  %s1327_s18 = smov 15  }
  0x28   : > { %s1116_s22 = sshll.u32 %s1444_s21, 4  ;;  %s1328_s19 = smov 1  }
  0x29   : > { %s1452_s8 = scalar_lea.vmem %s1936_s0, %s1116_s22  ;;  %s1329_s20 = smov 112  }
  0x2a   : > { %v1455_v0 = vld [vmem:[%s1452_s8] sm:$0xff]  ;;  %v1458_v1 = vld [vmem:[%s1452_s8 + $0x8] sm:$0xff]  ;;  %s1330_s23 = smov 17   ;;  %s1331_s29 = smov 16  }
  0x2b   : > { %v322_v2 = vadd.f32 %v1458_v1, %v1455_v0  ;;  %v325_v3 = vmul.f32 %v1455_v0, %v1455_v0  ;;  %v326_v4 = vmul.f32 %v1458_v1, %v1458_v1  ;;  %s1118_s9 = sshll.u32 %s1397_s28, 9  ;;  %s1334_s28 = smov [#allocation5]  }
  0x2c   : > { %s1893_s21 = scalar_lea.hbm %s1943_s7, %s1118_s9 }
  0x2d   : > { %323 = vadd.xlane.f32.xlu0 %v322_v2  ;;  %v327_v5 = vadd.f32 %v326_v4, %v325_v3  ;;  %v315_v3 = vld [vmem:[#allocation2 + $0x10] sm:$0xff]  ;;  %v316_v4 = vld [vmem:[#allocation2 + $0x18] sm:$0xff] }
  0x31   : > { %328 = vadd.xlane.f32.xlu0 %v327_v5 }
  0xb6   : > { %v324_v7 = vpop.xlane.xlu0 %323 }
  0xb7   : > { %v330_v8 = vmul.f32 %v324_v7, %v317_v6 }
  0xb9   : > { %v332_v9 = vsel %vm331_vm0, %v330_v8, 0.0 }
  0xba   : > { %v333_v10 = vrot.slane %v332_v9, 4  ;;  %v329_v11 = vpop.xlane.xlu0 %328 }
  0xbb   : > { %v339_v12 = vmul.f32 %v329_v11, %v317_v6 }
  0xbc   : > { %v334_v13 = vadd.f32 %v333_v10, %v332_v9 }
  0xbd   : > { %v340_v14 = vsel %vm331_vm0, %v339_v12, 0.0 }
  0xbe   : > { %v335_v15 = vrot.slane %v334_v13, 2  ;;  %v341_v16 = vrot.slane %v340_v14, 4 }
  0xc0   : > { %v336_v17 = vadd.f32 %v335_v15, %v334_v13  ;;  %v342_v18 = vadd.f32 %v341_v16, %v340_v14 }
  0xc2   : > { %v337_v19 = vrot.slane %v336_v17, 1  ;;  %v343_v20 = vrot.slane %v342_v18, 2 }
  0xc4   : > { %v344_v21 = vadd.f32 %v343_v20, %v342_v18  ;;  %v338_v22 = vadd.f32 %v337_v19, %v336_v17  ;;  %v1538_v19 = vld [vmem:[#allocation2] sm:$0xff] }
  0xc6   : > { %v345_v23 = vrot.slane %v344_v21, 1  ;;  %v347_v24 = vmul.f32 0.001953125, %v338_v22 }
  0xc8   : > { %v346_v25 = vadd.f32 %v345_v23, %v344_v21  ;;  %v354_v26 = vmul.f32 %v347_v24, %v317_v6  ;;  %v349_v28 = vmul.f32 %v347_v24, %v347_v24  ;;  %v1541_v21 = vld [vmem:[#allocation2 + $0x8] sm:$0xff] }
  0xca   : > { %v348_v27 = vmul.f32 0.001953125, %v346_v25  ;;  %356 = vrot.lane.b32.xlu0 %v354_v26, %s1321_s14 }
  0xcc   : > { %v350_v29 = vsub.f32 %v348_v27, %v349_v28 }
  0xce   : > { %v351_v30 = vmax.f32 %v350_v29, 0.0 }
  0xd0   : > { %v352_v31 = vadd.f32 1e-05, %v351_v30 }
  0xd2   : > { %1196 = vrsqrt.f32 %v352_v31 }
  0xdf   : > { %v1197_v32 = vpop.eup %1196 }
  0xe0   : > { %v363_v33 = vmul.f32 %v1197_v32, %v317_v6 }
  0xe2   : > { %365 = vrot.lane.b32.xlu1 %v363_v33, %s1321_s14  ;;  %s311_s14 = scalar_lea.vmem %s1937_s1, %s1116_s22  ;;  %s1332_s22 = smov 125  }
  0xe3   : > { %v553_v61 = vld [vmem:[%s311_s14 + $0x8] sm:$0xff]  ;;  %v552_v62 = vld [vmem:[%s311_s14] sm:$0xff] }
 0x13c   : > { %v357_v34 = vpop.permute.xlu0 %356 }
 0x13d   : > { %v360_v35 = vsel %vm359_vm1, %v357_v34, 0.0 }
 0x13e   : > { %361 = vadd.xlane.f32.xlu0 %v360_v35 }
 0x154   : > { %v366_v36 = vpop.permute.xlu1 %365 }
 0x155   : > { %v368_v37 = vsel %vm359_vm1, %v366_v36, 0.0 }
 0x156   : > { %369 = vadd.xlane.f32.xlu1 %v368_v37 }
 0x1c7   : > { %v362_v42 = vpop.xlane.xlu0 %361 }
 0x1c8   : > { %v371_v44 = vsub.f32 %v1455_v0, %v362_v42  ;;  %v372_v45 = vsub.f32 %v1458_v1, %v362_v42  ;;  %v1515_v0 = vshrl.u32 %v406_v63, 7  ;;  %v1517_v1 = vand.u32 127, %v406_v63 }
 0x1ca   : > { %v1520_v2 = vsub.s32 0, %v1515_v0  ;;  %vm527_vm2 = vcmp.lt.s32.totalorder %v1517_v1, 111  ;;  %v498_v18 = vsub.s32 6, %v1515_v0  ;;  %v515_v20 = vsub.s32 7, %v1515_v0 }
 0x1cb   : > { %vm493_vm4 = vcmp.lt.s32.totalorder %v1517_v1, 113  ;;  %v481_v25 = vsub.s32 5, %v1515_v0  ;;  %vm510_vm5 = vcmp.lt.s32.totalorder %v1517_v1, 112  ;;  %vm476_vm6 = vcmp.lt.s32.totalorder %v1517_v1, 127 }
 0x1cc   : > { %v1524_v5 = vrot.slane %v315_v3, %v1520_v2  ;;  %v1545_v24 = vrot.slane %v1538_v19, %v498_v18  ;;  %v1549_v26 = vrot.slane %v1541_v21, %v498_v18  ;;  %v1553_v27 = vrot.slane %v1538_v19, %v515_v20 }
 0x1cd   : > { %v1556_v28 = vrot.slane %v1541_v21, %v515_v20  ;;  %v1568_v34 = vrot.slane %v1538_v19, %v481_v25  ;;  %v1571_v35 = vrot.slane %v1541_v21, %v481_v25  ;;  %vm442_vm7 = vcmp.lt.s32.totalorder %v1517_v1, 15 }
 0x1ce   : > { %vm459_vm8 = vcmp.lt.s32.totalorder %v1517_v1, 1  ;;  %v430_v3 = vsub.s32 1, %v1515_v0  ;;  %vm408_vm9 = vcmp.lt.s32.totalorder %v1517_v1, 17  ;;  %vm425_vm10 = vcmp.lt.s32.totalorder %v1517_v1, 16 }
 0x1df   : > { %v370_v39 = vpop.xlane.xlu1 %369 }
 0x1e0   : > { %v373_v40 = vmul.f32 %v370_v39, %v317_v6 }
 0x1e2   : > { %376 = vperm.xlu1 %1185, %v373_v40  }
 0x1e6   : > { %1186 = vset.pattern.permute.xlu1 %v1323_v41 }
 0x1e7   : > { %383 = vperm.xlu1 %1186, %v317_v6   ;;  %v1527_v6 = vrot.slane %v316_v4, %v1520_v2 }
 0x1eb   : > { %1187 = vset.pattern.permute.xlu1 %v1322_v38 }
 0x25d   : > { %v377_v43 = vpop.permute.xlu1 %376 }
 0x25e   : > { %v379_v46 = vmul.f32 %v377_v43, %v371_v44  ;;  %v380_v47 = vmul.f32 %v377_v43, %v372_v45 }
 0x262   : > { %v384_v48 = vpop.permute.xlu1 %383 }
 0x263   : > { %v386_v49 = vadd.f32 %v384_v48, %v379_v46  ;;  %v387_v50 = vadd.f32 %v384_v48, %v380_v47  ;;  %v447_v47 = vsub.s32 2, %v1515_v0 }
 0x265   : > { %v1098_v51 = vmul.f32 -1.442695, %v386_v49  ;;  %v1099_v52 = vmul.f32 -1.442695, %v387_v50 }
 0x267   : > { %1198 = vpow2.f32 %v1098_v51 }
 0x268   : > { %1200 = vpow2.f32 %v1099_v52 }
 0x274   : > { %v1199_v53 = vpop.eup %1198 }
 0x275   : > { %v1201_v54 = vpop.eup %1200  ;;  %v394_v55 = vadd.f32 1.0, %v1199_v53 }
 0x276   : > { %v395_v56 = vadd.f32 1.0, %v1201_v54 }
 0x277   : > { %1202 = vrcp.f32 %v394_v55  ;;  %v1589_v55 = vrot.slane %v1538_v19, %v447_v47 }
 0x278   : > { %1204 = vrcp.f32 %v395_v56  ;;  %v1592_v56 = vrot.slane %v1541_v21, %v447_v47 }
 0x284   : > { %v1203_v57 = vpop.eup %1202 }
 0x285   : > { %v1205_v58 = vpop.eup %1204  ;;  %v1474_v59 = vmul.f32 %v1203_v57, %v386_v49 }
 0x286   : > { %v1476_v60 = vmul.f32 %v1205_v58, %v387_v50  ;;  %v464_v50 = vsub.s32 3, %v1515_v0  ;;  %v1621_v0 = vrot.slane %v1541_v21, %v1520_v2 }
 0x287   : > { %523 = vrot.lane.b32.xlu0 %v1474_v59, %s1324_s15 }
 0x288   : > { %525 = vrot.lane.b32.xlu1 %v1476_v60, %s1324_s15  ;;  %v1596_v57 = vrot.slane %v1538_v19, %v464_v50  ;;  %v1599_v58 = vrot.slane %v1541_v21, %v464_v50 }
 0x28b   : > { %474 = vrot.lane.b32.xlu0 %v1476_v60, %s1325_s16 }
 0x28c   : > { %489 = vrot.lane.b32.xlu1 %v1474_v59, %s1326_s17 }
 0x28f   : > { %440 = vrot.lane.b32.xlu0 %v1476_v60, %s1327_s18 }
 0x290   : > { %491 = vrot.lane.b32.xlu1 %v1476_v60, %s1326_s17 }
 0x293   : > { %457 = vrot.lane.b32.xlu0 %v1476_v60, %s1328_s19 }
 0x294   : > { %506 = vrot.lane.b32.xlu1 %v1474_v59, %s1329_s20 }
 0x297   : > { %404 = vrot.lane.b32.xlu0 %v1476_v60, %s1330_s23 }
 0x298   : > { %508 = vrot.lane.b32.xlu1 %v1476_v60, %s1329_s20 }
 0x29b   : > { %423 = vrot.lane.b32.xlu0 %v1476_v60, %s1331_s29 }
 0x29c   : > { %472 = vrot.lane.b32.xlu1 %v1474_v59, %s1325_s16 }
 0x29f   : > { %561 = vperm.xlu0 %1188, %v553_v61  }
 0x2a0   : > { %438 = vrot.lane.b32.xlu1 %v1474_v59, %s1327_s18 }
 0x2a4   : > { %455 = vrot.lane.b32.xlu1 %v1474_v59, %s1328_s19 }
 0x2a8   : > { %402 = vrot.lane.b32.xlu1 %v1474_v59, %s1330_s23 }
 0x2ac   : > { %421 = vrot.lane.b32.xlu1 %v1474_v59, %s1331_s29 }
 0x2b0   : > { %556 = vperm.xlu1 %1187, %v552_v62  }
 0x2f9   : > { %v524_v7 = vpop.permute.xlu0 %523 }
 0x2fa   : > { %v526_v8 = vpop.permute.xlu1 %525 }
 0x2fb   : > { %v528_v9 = vsel %vm527_vm2, %v524_v7, %v526_v8  ;;  %v529_v10 = vsel %vm527_vm2, %v526_v8, %v524_v7 }
 0x2fc   : > { %v538_v11 = vmul.f32 %v1524_v5, %v528_v9  ;;  %v539_v12 = vmul.f32 %v1527_v6, %v529_v10 }
 0x2fd   : > { %v475_v22 = vpop.permute.xlu0 %474 }
 0x2fe   : > { %v490_v13 = vpop.permute.xlu1 %489  ;;  %v549_v14 = vpack.c.bf16 %v539_v12, %v539_v12  ;;  %v548_v15 = vpack.c.bf16 %v538_v11, %v538_v11 }
 0x300   : > { %1101 = vmatprep.subr.msk.bf16.mxu0 %vm573_vm3, %v549_v14  ;;  %v575_v16 = vsel %vm573_vm3, %v548_v15, 0  ;;  %v1617_v14 = vrot.slane %v1538_v19, %v1520_v2  ;;  %v1625_v15 = vrot.slane %v1538_v19, %v430_v3 }
 0x301   : > { %587 = vmatpush1.bf16.msra.mxu0 %v575_v16  ;;  %v441_v38 = vpop.permute.xlu0 %440  ;;  %v1628_v16 = vrot.slane %v1541_v21, %v430_v3 }
 0x302   : > { %v492_v17 = vpop.permute.xlu1 %491 }
 0x303   : > { %v494_v29 = vsel %vm493_vm4, %v490_v13, %v492_v17  ;;  %v495_v30 = vsel %vm493_vm4, %v492_v17, %v490_v13 }
 0x304   : > { %v504_v36 = vmul.f32 %v1545_v24, %v494_v29  ;;  %v505_v37 = vmul.f32 %v1549_v26, %v495_v30 }
 0x305   : > { %v458_v51 = vpop.permute.xlu0 %457 }
 0x306   : > { %v507_v23 = vpop.permute.xlu1 %506 }
 0x309   : > { %v405_v4 = vpop.permute.xlu0 %404 }
 0x30a   : > { %v509_v31 = vpop.permute.xlu1 %508 }
 0x30b   : > { %v511_v32 = vsel %vm510_vm5, %v507_v23, %v509_v31  ;;  %v512_v33 = vsel %vm510_vm5, %v509_v31, %v507_v23 }
 0x30c   : > { %v521_v39 = vmul.f32 %v1553_v27, %v511_v32  ;;  %v522_v40 = vmul.f32 %v1556_v28, %v512_v33  ;;  %v1192_v32 = vld [vmem:[%s1941_s5] sm:$0xff]  }
 0x30d   : > { %v424_v20 = vpop.permute.xlu0 %423 }
 0x30e   : > { %v473_v42 = vpop.permute.xlu1 %472  ;;  %v547_v43 = vpack.c.bf16 %v522_v40, %v505_v37  ;;  %v546_v44 = vpack.c.bf16 %v521_v39, %v504_v36 }
 0x30f   : > { %v477_v45 = vsel %vm476_vm6, %v473_v42, %v475_v22  ;;  %v478_v46 = vsel %vm476_vm6, %v475_v22, %v473_v42 }
 0x310   : > { %v487_v48 = vmul.f32 %v1568_v34, %v477_v45  ;;  %v488_v49 = vmul.f32 %v1571_v35, %v478_v46  ;;  %588 = vmatprep.subr.bf16.mxu0 %v547_v43 }
 0x311   : > { %589 = vmatpush1.bf16.msra.mxu0 %v546_v44 }
 0x312   : > { %v439_v52 = vpop.permute.xlu1 %438  ;;  %v545_v53 = vpack.c.bf16 %v488_v49, %v1476_v60  ;;  %v544_v54 = vpack.c.bf16 %v487_v48, %v1474_v59 }
 0x313   : > { %v443_v60 = vsel %vm442_vm7, %v439_v52, %v441_v38  ;;  %v444_v59 = vsel %vm442_vm7, %v441_v38, %v439_v52 }
 0x314   : > { %590 = vmatprep.subr.bf16.mxu0 %v545_v53  ;;  %v453_v7 = vmul.f32 %v1589_v55, %v444_v59  ;;  %v454_v8 = vmul.f32 %v1592_v56, %v443_v60  ;;  %v1673_v59 = vld [vmem:[%s1940_s4 + $0x8] sm:$0xff] }
 0x315   : > { %591 = vmatpush1.bf16.msra.mxu0 %v544_v54  ;;  %v1668_v54 = vld [vmem:[%s1940_s4] sm:$0xff] }
 0x316   : > { %v456_v61 = vpop.permute.xlu1 %455 }
 0x317   : > { %v460_v62 = vsel %vm459_vm8, %v456_v61, %v458_v51  ;;  %v461_v63 = vsel %vm459_vm8, %v458_v51, %v456_v61 }
 0x318   : > { %v470_v9 = vmul.f32 %v1596_v57, %v461_v63  ;;  %v471_v10 = vmul.f32 %v1599_v58, %v460_v62 }
 0x31a   : > { %v403_v11 = vpop.permute.xlu1 %402  ;;  %v543_v12 = vpack.c.bf16 %v471_v10, %v454_v8  ;;  %v542_v13 = vpack.c.bf16 %v470_v9, %v453_v7  ;;  %v562_v40 = vpop.permute.xlu0 %561 }
 0x31b   : > { %v409_v17 = vsel %vm408_vm9, %v403_v11, %v405_v4  ;;  %v410_v18 = vsel %vm408_vm9, %v405_v4, %v403_v11 }
 0x31c   : > { %592 = vmatprep.subr.bf16.mxu0 %v543_v12  ;;  %v419_v19 = vmul.f32 %v1617_v14, %v410_v18  ;;  %v420_v21 = vmul.f32 %v1621_v0, %v409_v17 }
 0x31d   : > { %593 = vmatpush1.bf16.msra.mxu0 %v542_v13 }
 0x31e   : > { %v422_v22 = vpop.permute.xlu1 %421 }
 0x31f   : > { %v426_v2 = vsel %vm425_vm10, %v422_v22, %v424_v20  ;;  %v427_v23 = vsel %vm425_vm10, %v424_v20, %v422_v22 }
 0x320   : > { %v436_v25 = vmul.f32 %v1625_v15, %v427_v23  ;;  %v437_v29 = vmul.f32 %v1628_v16, %v426_v2 }
 0x322   : > { %v541_v30 = vpack.c.bf16 %v437_v29, %v420_v21  ;;  %v540_v31 = vpack.c.bf16 %v436_v25, %v419_v19 }
 0x324   : > { %594 = vmatprep.subr.bf16.mxu0 %v541_v30 }
 0x325   : > { %595 = vmatpush1.bf16.msra.mxu0 %v540_v31 }
 0x328   : > { %1102 = vmatmul.mubr.msk.bf16.vlgmr.msra.gmra.mxu0 %vm569_vm11, %v1192_v32 }
 0x32b   : > { %v557_v33 = vpop.permute.xlu1 %556 }
 0x3e8   : > { %v614_v36 = vpop.f32.mrf.mxu0 }
 0x3e9   : > { %v1645_v38 = vadd.f32 %v614_v36, %v557_v33 }
 0x3ea   : > { %v616_v37 = vpop.f32.mrf.mxu0 }
 0x3eb   : > { %v1647_v39 = vadd.f32 %v616_v37, %v557_v33  ;;  %v629_v48 = vmul.f32 %v1645_v38, %v1645_v38 }
 0x3ec   : > { %v618_v42 = vpop.f32.mrf.mxu0 }
 0x3ed   : > { %v623_v43 = vadd.f32 %v1647_v39, %v1645_v38  ;;  %v630_v44 = vmul.f32 %v1647_v39, %v1647_v39  ;;  %v1653_v46 = vadd.f32 %v618_v42, %v562_v40 }
 0x3ee   : > { %v620_v45 = vpop.f32.mrf.mxu0 }
 0x3ef   : > { %v1655_v47 = vadd.f32 %v620_v45, %v562_v40  ;;  %624 = vadd.xlane.f32.xlu1 %v623_v43  ;;  %v633_v50 = vadd.f32 %v630_v44, %v629_v48  ;;  %v631_v52 = vmul.f32 %v1653_v46, %v1653_v46 }
 0x3f1   : > { %v626_v49 = vadd.f32 %v1655_v47, %v1653_v46  ;;  %v632_v51 = vmul.f32 %v1655_v47, %v1655_v47 }
 0x3f3   : > { %627 = vadd.xlane.f32.xlu0 %v626_v49  ;;  %634 = vadd.xlane.f32.xlu1 %v633_v50  ;;  %v636_v53 = vadd.f32 %v632_v51, %v631_v52 }
 0x3f7   : > { %637 = vadd.xlane.f32.xlu0 %v636_v53 }
 0x478   : > { %v625_v60 = vpop.xlane.xlu1 %624 }
 0x479   : > { %v639_v61 = vmul.f32 %v625_v60, %v1668_v54 }
 0x47b   : > { %v642_v4 = vsel %vm641_vm12, %v639_v61, 0.0 }
 0x47c   : > { %v628_v62 = vpop.xlane.xlu0 %627  ;;  %v635_v63 = vpop.xlane.xlu1 %634 }
 0x47d   : > { %v640_v3 = vmul.f32 %v628_v62, %v1673_v59  ;;  %v651_v8 = vmul.f32 %v635_v63, %v1668_v54 }
 0x47f   : > { %v643_v7 = vsel %vm641_vm12, %v640_v3, 0.0  ;;  %v653_v13 = vsel %vm641_vm12, %v651_v8, 0.0 }
 0x480   : > { %v644_v9 = vadd.f32 %v643_v7, %v642_v4  ;;  %v638_v10 = vpop.xlane.xlu0 %637 }
 0x481   : > { %v652_v11 = vmul.f32 %v638_v10, %v1673_v59 }
 0x482   : > { %v645_v12 = vrot.slane %v644_v9, 4 }
 0x483   : > { %v654_v17 = vsel %vm641_vm12, %v652_v11, 0.0 }
 0x484   : > { %v646_v18 = vadd.f32 %v645_v12, %v644_v9  ;;  %v655_v20 = vadd.f32 %v654_v17, %v653_v13 }
 0x486   : > { %v647_v22 = vrot.slane %v646_v18, 2  ;;  %v656_v2 = vrot.slane %v655_v20, 4 }
 0x488   : > { %v648_v23 = vadd.f32 %v647_v22, %v646_v18  ;;  %v657_v19 = vadd.f32 %v656_v2, %v655_v20 }
 0x48a   : > { %v649_v21 = vrot.slane %v648_v23, 1  ;;  %v658_v25 = vrot.slane %v657_v19, 2 }
 0x48c   : > { %v650_v29 = vadd.f32 %v649_v21, %v648_v23  ;;  %v659_v30 = vadd.f32 %v658_v25, %v657_v19 }
 0x48e   : > { %v662_v31 = vmul.f32 0.0009765625, %v650_v29  ;;  %v660_v32 = vrot.slane %v659_v30, 1 }
 0x490   : > { %v661_v33 = vadd.f32 %v660_v32, %v659_v30  ;;  %v664_v37 = vmul.f32 %v662_v31, %v662_v31  ;;  %v669_v53 = vmul.f32 %v662_v31, %v1668_v54  ;;  %v670_v60 = vmul.f32 %v662_v31, %v1673_v59 }
 0x492   : > { %v663_v36 = vmul.f32 0.0009765625, %v661_v33 }
 0x494   : > { %v665_v40 = vsub.f32 %v663_v36, %v664_v37 }
 0x496   : > { %v666_v42 = vmax.f32 %v665_v40, 0.0 }
 0x498   : > { %v667_v43 = vadd.f32 1e-05, %v666_v42 }
 0x49a   : > { %1206 = vrsqrt.f32 %v667_v43 }
 0x4a7   : > { %v1207_v44 = vpop.eup %1206 }
 0x4a8   : > { %v686_v45 = vmul.f32 %v1207_v44, %v1673_v59  ;;  %v685_v48 = vmul.f32 %v1207_v44, %v1668_v54 }
 0x4aa   : > { %691 = vrot.lane.b32.xlu0 %v686_v45, %s1332_s22  ;;  %689 = vrot.lane.b32.xlu1 %v685_v48, %s1332_s22 }
 0x51c   : > { %v692_v49 = vpop.permute.xlu0 %691  ;;  %v690_v50 = vpop.permute.xlu1 %689 }
 0x51d   : > { %v698_v51 = vsel %vm359_vm1, %v692_v49, 0.0  ;;  %v695_v52 = vsel %vm359_vm1, %v690_v50, 0.0 }
 0x51e   : > { %699 = vadd.xlane.f32.xlu0 %v698_v51  ;;  %696 = vadd.xlane.f32.xlu1 %v695_v52 }
 0x52f   : > { %673 = vrot.lane.b32.xlu1 %v669_v53, %s1332_s22 }
 0x534   : > { %675 = vrot.lane.b32.xlu0 %v670_v60, %s1332_s22 }
 0x5a7   : > { %v700_v61 = vpop.xlane.xlu0 %699  ;;  %v697_v62 = vpop.xlane.xlu1 %696 }
 0x5a8   : > { %v705_v8 = vmul.f32 %v697_v62, %v1668_v54  ;;  %v706_v9 = vmul.f32 %v700_v61, %v1673_v59 }
 0x5ab   : > { %v676_v63 = vpop.permute.xlu0 %675  ;;  %v674_v3 = vpop.permute.xlu1 %673 }
 0x5ac   : > { %v682_v4 = vsel %vm359_vm1, %v676_v63, 0.0  ;;  %v679_v7 = vsel %vm359_vm1, %v674_v3, 0.0  ;;  %v1195_v3 = vld [vmem:[%s1942_s6 + $0x4] ss:$8 sps:$4 sm:$0xff]  }
 0x5ad   : > { %683 = vadd.xlane.f32.xlu0 %v682_v4  ;;  %680 = vadd.xlane.f32.xlu1 %v679_v7  ;;  %v1333_v4 = vmov 2  }
 0x5ae   : > { %1110 = vmatprep.mubr.msk.bf16.mxu1 %vm930_vm13, %v1195_v3 }
 0x5be   : > { %709 = vperm.xlu1 %1187, %v705_v8  }
 0x5c2   : > { %1189 = vset.pattern.permute.xlu1 %v1323_v41 }
 0x5c3   : > { %714 = vperm.xlu0 %1188, %v706_v9   ;;  %723 = vperm.xlu1 %1189, %v1668_v54  }
 0x5c7   : > { %728 = vperm.xlu1 %1189, %v1673_v59   ;;  %1190 = vset.pattern.permute.xlu0 %v1333_v4 }
 0x5cb   : > { %1191 = vset.pattern.permute.xlu1 %v1333_v4 }
 0x636   : > { %v681_v10 = vpop.xlane.xlu1 %680  ;;  %v684_v11 = vpop.xlane.xlu0 %683 }
 0x637   : > { %v701_v13 = vsub.f32 %v1645_v38, %v681_v10  ;;  %v702_v17 = vsub.f32 %v1647_v39, %v681_v10  ;;  %v703_v23 = vsub.f32 %v1653_v46, %v684_v11  ;;  %v704_v41 = vsub.f32 %v1655_v47, %v684_v11 }
 0x63a   : > { %v710_v12 = vpop.permute.xlu1 %709 }
 0x63b   : > { %v717_v18 = vmul.f32 %v710_v12, %v701_v13  ;;  %v718_v20 = vmul.f32 %v710_v12, %v702_v17 }
 0x63e   : > { %v715_v22 = vpop.permute.xlu0 %714  ;;  %v724_v2 = vpop.permute.xlu1 %723 }
 0x63f   : > { %v731_v19 = vadd.f32 %v724_v2, %v717_v18  ;;  %v732_v21 = vadd.f32 %v724_v2, %v718_v20  ;;  %v719_v25 = vmul.f32 %v715_v22, %v703_v23  ;;  %v720_v29 = vmul.f32 %v715_v22, %v704_v41 }
 0x641   : > { %v1103_v30 = vmul.f32 -1.442695, %v731_v19  ;;  %v1104_v31 = vmul.f32 -1.442695, %v732_v21 }
 0x642   : > { %v729_v32 = vpop.permute.xlu1 %728 }
 0x643   : > { %1208 = vpow2.f32 %v1103_v30  ;;  %v733_v33 = vadd.f32 %v729_v32, %v719_v25  ;;  %v734_v38 = vadd.f32 %v729_v32, %v720_v29 }
 0x644   : > { %1210 = vpow2.f32 %v1104_v31 }
 0x645   : > { %v1105_v39 = vmul.f32 -1.442695, %v733_v33  ;;  %v1106_v36 = vmul.f32 -1.442695, %v734_v38 }
 0x647   : > { %1212 = vpow2.f32 %v1105_v39 }
 0x648   : > { %1214 = vpow2.f32 %v1106_v36 }
 0x650   : > { %v1209_v37 = vpop.eup %1208 }
 0x651   : > { %v1211_v40 = vpop.eup %1210  ;;  %v747_v46 = vadd.f32 1.0, %v1209_v37 }
 0x652   : > { %v748_v42 = vadd.f32 1.0, %v1211_v40 }
 0x653   : > { %1216 = vrcp.f32 %v747_v46 }
 0x654   : > { %v1213_v47 = vpop.eup %1212  ;;  %1218 = vrcp.f32 %v748_v42 }
 0x655   : > { %v1215_v43 = vpop.eup %1214  ;;  %v749_v44 = vadd.f32 1.0, %v1213_v47 }
 0x656   : > { %v750_v45 = vadd.f32 1.0, %v1215_v43 }
 0x657   : > { %1220 = vrcp.f32 %v749_v44 }
 0x658   : > { %1222 = vrcp.f32 %v750_v45 }
 0x660   : > { %v1217_v48 = vpop.eup %1216 }
 0x661   : > { %v1696_v49 = vmul.f32 %v1217_v48, %v731_v19  ;;  %v1219_v50 = vpop.eup %1218 }
 0x662   : > { %v1700_v53 = vmul.f32 %v1219_v50, %v732_v21 }
 0x663   : > { %873 = vrot.lane.b32.xlu0 %v1696_v49, %s1329_s20 }
 0x664   : > { %v1221_v51 = vpop.eup %1220 }
 0x665   : > { %v1223_v52 = vpop.eup %1222  ;;  %v1702_v60 = vmul.f32 %v1221_v51, %v733_v33 }
 0x666   : > { %v1704_v61 = vmul.f32 %v1223_v52, %v734_v38 }
 0x667   : > { %877 = vrot.lane.b32.xlu0 %v1700_v53, %s1329_s20  ;;  %875 = vrot.lane.b32.xlu1 %v1702_v60, %s1329_s20  ;;  %v835_v62 = vpack.c.bf16 %v1702_v60, %v1696_v49 }
 0x668   : > { %v836_v63 = vpack.c.bf16 %v1704_v61, %v1700_v53 }
 0x66b   : > { %855 = vrot.lane.b32.xlu0 %v1696_v49, %s1326_s17  ;;  %879 = vrot.lane.b32.xlu1 %v1704_v61, %s1329_s20 }
 0x66f   : > { %859 = vrot.lane.b32.xlu0 %v1700_v53, %s1326_s17  ;;  %857 = vrot.lane.b32.xlu1 %v1702_v60, %s1326_s17 }
 0x673   : > { %837 = vrot.lane.b32.xlu0 %v1696_v49, %s1325_s16  ;;  %861 = vrot.lane.b32.xlu1 %v1704_v61, %s1326_s17  ;;  %s1256_s17 = sshll.u32 %s1334_s28, 4  ;;  %s1257_s17 = int_to_ptr.vmem [resolvable:$false] %s1256_s17 }
 0x677   : > { %841 = vrot.lane.b32.xlu0 %v1700_v53, %s1325_s16  ;;  %839 = vrot.lane.b32.xlu1 %v1702_v60, %s1325_s16 }
 0x67b   : > { %817 = vrot.lane.b32.xlu0 %v1696_v49, %s1328_s19  ;;  %843 = vrot.lane.b32.xlu1 %v1704_v61, %s1325_s16 }
 0x67f   : > { %821 = vrot.lane.b32.xlu0 %v1700_v53, %s1328_s19  ;;  %819 = vrot.lane.b32.xlu1 %v1702_v60, %s1328_s19 }
 0x683   : > { %799 = vrot.lane.b32.xlu0 %v1696_v49, %s1327_s18  ;;  %823 = vrot.lane.b32.xlu1 %v1704_v61, %s1328_s19 }
 0x687   : > { %803 = vrot.lane.b32.xlu0 %v1700_v53, %s1327_s18  ;;  %801 = vrot.lane.b32.xlu1 %v1702_v60, %s1327_s18 }
 0x68b   : > { %781 = vrot.lane.b32.xlu0 %v1696_v49, %s1331_s29  ;;  %805 = vrot.lane.b32.xlu1 %v1704_v61, %s1327_s18  ;;  %s299_s18 = sand.u32 1, %s1308_s25  }
 0x68c   : > { %s1093_s19 = sshll.u32 %s299_s18, 5  ;;  %s1895_s22 = scalar_lea.sflag [#allocation4], %s299_s18 }
 0x68d   : > { %s301_s20 = scalar_lea.vmem [#allocation5], %s1093_s19 }
 0x68f   : > { %785 = vrot.lane.b32.xlu0 %v1700_v53, %s1331_s29  ;;  %783 = vrot.lane.b32.xlu1 %v1702_v60, %s1331_s29 }
 0x693   : > { %763 = vrot.lane.b32.xlu0 %v1696_v49, %s1330_s23  ;;  %787 = vrot.lane.b32.xlu1 %v1704_v61, %s1331_s29 }
 0x697   : > { %767 = vrot.lane.b32.xlu0 %v1700_v53, %s1330_s23  ;;  %765 = vrot.lane.b32.xlu1 %v1702_v60, %s1330_s23 }
 0x69b   : > { %891 = vrot.lane.b32.xlu0 %v1696_v49, %s1324_s15  ;;  %769 = vrot.lane.b32.xlu1 %v1704_v61, %s1330_s23  ;;  %s1001_s23 = sshll.u32 %s301_s20, 4  ;;  %s1888_s23 = int_to_ptr.vmem [resolvable:$true] %s1001_s23 }
 0x69c   : > { %s1252_s16 = scalar_lea.vmem %s1888_s23, 512  ;;  %p1259_p11 = scmp.lt.s32.totalorder %s1888_s23, %s1257_s17 }
 0x69d   : > { %p1253_p6 = scmp.ne.s32.totalorder %s1888_s23, %s1252_s16 }
 0x69f   : > { %895 = vrot.lane.b32.xlu0 %v1700_v53, %s1324_s15  ;;  %893 = vrot.lane.b32.xlu1 %v1702_v60, %s1324_s15  ;;  %p1254_p9 = pnand %p1253_p6, %p1414_p5 }
 0x6a1   : > { %p1255_p10 = pneg %p1254_p9 }
 0x6a3   : > { %897 = vrot.lane.b32.xlu1 %v1704_v61, %s1324_s15  ;;  %914 = vperm.xlu0 %1190, %v1668_v54  }
 0x6a7   : > { %918 = vperm.xlu1 %1191, %v1673_v59  }
 0x6d5   : > { %v874_v7 = vpop.permute.xlu0 %873 }
 0x6d9   : > { %v878_v8 = vpop.permute.xlu0 %877  ;;  %v876_v9 = vpop.permute.xlu1 %875 }
 0x6da   : > { %v881_v10 = vsel %vm510_vm5, %v874_v7, %v878_v8  ;;  %v883_v11 = vsel %vm510_vm5, %v878_v8, %v874_v7 }
 0x6db   : > { %v885_v54 = vmul.f32 %v881_v10, %v1553_v27  ;;  %v886_v20 = vmul.f32 %v883_v11, %v1556_v28 }
 0x6dd   : > { %v856_v12 = vpop.permute.xlu0 %855  ;;  %v880_v13 = vpop.permute.xlu1 %879 }
 0x6de   : > { %v882_v17 = vsel %vm510_vm5, %v876_v9, %v880_v13  ;;  %v884_v18 = vsel %vm510_vm5, %v880_v13, %v876_v9 }
 0x6df   : > { %v887_v59 = vmul.f32 %v882_v17, %v1553_v27  ;;  %v888_v22 = vmul.f32 %v884_v18, %v1556_v28 }
 0x6e1   : > { %v860_v2 = vpop.permute.xlu0 %859  ;;  %v858_v23 = vpop.permute.xlu1 %857  ;;  %v890_v41 = vpack.c.bf16 %v888_v22, %v886_v20  ;;  %v889_v19 = vpack.c.bf16 %v887_v59, %v885_v54 }
 0x6e2   : > { %v863_v21 = vsel %vm493_vm4, %v856_v12, %v860_v2  ;;  %v865_v25 = vsel %vm493_vm4, %v860_v2, %v856_v12 }
 0x6e3   : > { %940 = vmatprep.subr.bf16.mxu1 %v890_v41  ;;  %v867_v31 = vmul.f32 %v863_v21, %v1545_v24  ;;  %v868_v32 = vmul.f32 %v865_v25, %v1549_v26 }
 0x6e4   : > { %941 = vmatpush1.bf16.msra.mxu1 %v889_v19 }
 0x6e5   : > { %v838_v29 = vpop.permute.xlu0 %837  ;;  %v862_v30 = vpop.permute.xlu1 %861 }
 0x6e6   : > { %v864_v27 = vsel %vm493_vm4, %v858_v23, %v862_v30  ;;  %v866_v28 = vsel %vm493_vm4, %v862_v30, %v858_v23 }
 0x6e7   : > { %v869_v33 = vmul.f32 %v864_v27, %v1545_v24  ;;  %v870_v38 = vmul.f32 %v866_v28, %v1549_v26 }
 0x6e9   : > { %v842_v39 = vpop.permute.xlu0 %841  ;;  %v840_v36 = vpop.permute.xlu1 %839  ;;  %v872_v37 = vpack.c.bf16 %v870_v38, %v868_v32  ;;  %v871_v40 = vpack.c.bf16 %v869_v33, %v867_v31 }
 0x6ea   : > { %v845_v46 = vsel %vm476_vm6, %v838_v29, %v842_v39  ;;  %v847_v42 = vsel %vm476_vm6, %v842_v39, %v838_v29 }
 0x6eb   : > { %942 = vmatprep.subr.bf16.mxu1 %v872_v37  ;;  %v849_v26 = vmul.f32 %v845_v46, %v1568_v34  ;;  %v850_v45 = vmul.f32 %v847_v42, %v1571_v35 }
 0x6ec   : > { %943 = vmatpush1.bf16.msra.mxu1 %v871_v40 }
 0x6ed   : > { %v818_v47 = vpop.permute.xlu0 %817  ;;  %v844_v43 = vpop.permute.xlu1 %843 }
 0x6ee   : > { %v846_v44 = vsel %vm476_vm6, %v840_v36, %v844_v43  ;;  %v848_v24 = vsel %vm476_vm6, %v844_v43, %v840_v36 }
 0x6ef   : > { %v851_v48 = vmul.f32 %v846_v44, %v1568_v34  ;;  %v852_v50 = vmul.f32 %v848_v24, %v1571_v35 }
 0x6f1   : > { %v822_v51 = vpop.permute.xlu0 %821  ;;  %v820_v52 = vpop.permute.xlu1 %819  ;;  %v854_v3 = vpack.c.bf16 %v852_v50, %v850_v45  ;;  %v853_v4 = vpack.c.bf16 %v851_v48, %v849_v26 }
 0x6f2   : > { %v825_v7 = vsel %vm459_vm8, %v818_v47, %v822_v51  ;;  %v827_v8 = vsel %vm459_vm8, %v822_v51, %v818_v47 }
 0x6f3   : > { %944 = vmatprep.subr.bf16.mxu1 %v854_v3  ;;  %v829_v11 = vmul.f32 %v827_v8, %v1596_v57  ;;  %v830_v12 = vmul.f32 %v825_v7, %v1599_v58 }
 0x6f4   : > { %945 = vmatpush1.bf16.msra.mxu1 %v853_v4  ;;  %v1225_v4 = vld [vmem:[%s1452_s8] sm:$0xff] }
 0x6f5   : > { %v800_v9 = vpop.permute.xlu0 %799  ;;  %946 = vmatprep.subr.bf16.mxu1 %v836_v63  ;;  %v824_v34 = vpop.permute.xlu1 %823  ;;  %v909_v7 = vpack.c.bf16 %v1225_v4, %v1225_v4 }
 0x6f6   : > { %v826_v35 = vsel %vm459_vm8, %v820_v52, %v824_v34  ;;  %v828_v10 = vsel %vm459_vm8, %v824_v34, %v820_v52  ;;  %v1224_v52 = vld [vmem:[%s1452_s8 + $0x8] sm:$0xff]  ;;  %s1258_s8 = scalar_lea.vmem %s1257_s17, 1024 }
 0x6f7   : > { %v831_v13 = vmul.f32 %v828_v10, %v1596_v57  ;;  %v832_v17 = vmul.f32 %v826_v35, %v1599_v58  ;;  %v910_v3 = vpack.c.bf16 %v1224_v52, %v1224_v52  ;;  %p1260_p12 = scmp.lt.s32.totalorder %s1258_s8, %s1252_s16 }
 0x6f8   : > { %947 = vmatpush1.bf16.msra.mxu1 %v835_v62 }
 0x6f9   : > { %v804_v53 = vpop.permute.xlu0 %803  ;;  %v802_v61 = vpop.permute.xlu1 %801  ;;  %v834_v63 = vpack.c.bf16 %v832_v17, %v830_v12  ;;  %v833_v18 = vpack.c.bf16 %v831_v13, %v829_v11  ;;  %p1261_p13 = por %p1260_p12, %p1259_p11 }
 0x6fa   : > { %v807_v54 = vsel %vm442_vm7, %v800_v9, %v804_v53  ;;  %v809_v59 = vsel %vm442_vm7, %v804_v53, %v800_v9 }
 0x6fb   : > { %948 = vmatprep.subr.bf16.mxu1 %v834_v63  ;;  %v811_v60 = vmul.f32 %v809_v59, %v1589_v55  ;;  %v812_v62 = vmul.f32 %v807_v54, %v1592_v56  ;;  %p1262_p0 = pnand %p1261_p13, %p1255_p10 }
 0x6fc   : > { %949 = vmatpush1.bf16.msra.mxu1 %v833_v18 }
 0x6fd   : > { %v782_v20 = vpop.permute.xlu0 %781  ;;  %v806_v57 = vpop.permute.xlu1 %805 }
 0x6fe   : > { %v808_v58 = vsel %vm442_vm7, %v802_v61, %v806_v57  ;;  %v810_v49 = vsel %vm442_vm7, %v806_v57, %v802_v61  ;;  %v1193_v61 = vld [vmem:[%s1942_s6] ss:$8 sps:$4 sm:$0xff]  }
 0x6ff   : > { %v813_v22 = vmul.f32 %v810_v49, %v1589_v55  ;;  %v814_v2 = vmul.f32 %v808_v58, %v1592_v56 }
 0x701   : > { %v786_v23 = vpop.permute.xlu0 %785  ;;  %v784_v41 = vpop.permute.xlu1 %783  ;;  %v816_v19 = vpack.c.bf16 %v814_v2, %v812_v62  ;;  %v815_v21 = vpack.c.bf16 %v813_v22, %v811_v60 }
 0x702   : > { %v789_v25 = vsel %vm425_vm10, %v782_v20, %v786_v23  ;;  %v791_v29 = vsel %vm425_vm10, %v786_v23, %v782_v20 }
 0x703   : > { %950 = vmatprep.subr.bf16.mxu1 %v816_v19  ;;  %v793_v56 = vmul.f32 %v791_v29, %v1625_v15  ;;  %v794_v31 = vmul.f32 %v789_v25, %v1628_v16 }
 0x704   : > { %951 = vmatpush1.bf16.msra.mxu1 %v815_v21 }
 0x705   : > { %v764_v30 = vpop.permute.xlu0 %763  ;;  %v788_v27 = vpop.permute.xlu1 %787 }
 0x706   : > { %v790_v28 = vsel %vm425_vm10, %v784_v41, %v788_v27  ;;  %v792_v55 = vsel %vm425_vm10, %v788_v27, %v784_v41 }
 0x707   : > { %v795_v32 = vmul.f32 %v792_v55, %v1625_v15  ;;  %v796_v33 = vmul.f32 %v790_v28, %v1628_v16 }
 0x709   : > { %v768_v38 = vpop.permute.xlu0 %767  ;;  %v766_v39 = vpop.permute.xlu1 %765  ;;  %v798_v36 = vpack.c.bf16 %v796_v33, %v794_v31  ;;  %v797_v37 = vpack.c.bf16 %v795_v32, %v793_v56 }
 0x70a   : > { %v771_v40 = vsel %vm408_vm9, %v764_v30, %v768_v38  ;;  %v773_v46 = vsel %vm408_vm9, %v768_v38, %v764_v30 }
 0x70b   : > { %952 = vmatprep.subr.bf16.mxu1 %v798_v36  ;;  %v775_v43 = vmul.f32 %v773_v46, %v1617_v14  ;;  %v776_v44 = vmul.f32 %v771_v40, %v1621_v0 }
 0x70c   : > { %953 = vmatpush1.bf16.msra.mxu1 %v797_v37 }
 0x70d   : > { %v892_v42 = vpop.permute.xlu0 %891  ;;  %v770_v47 = vpop.permute.xlu1 %769 }
 0x70e   : > { %v772_v15 = vsel %vm408_vm9, %v766_v39, %v770_v47  ;;  %v774_v16 = vsel %vm408_vm9, %v770_v47, %v766_v39 }
 0x70f   : > { %v777_v24 = vmul.f32 %v774_v16, %v1617_v14  ;;  %v778_v26 = vmul.f32 %v772_v15, %v1621_v0  ;;  %v935_v14 = vsel %vm573_vm3, %v909_v7, 0 }
 0x711   : > { %v896_v45 = vpop.permute.xlu0 %895  ;;  %v894_v48 = vpop.permute.xlu1 %893  ;;  %v780_v50 = vpack.c.bf16 %v778_v26, %v776_v44  ;;  %v779_v51 = vpack.c.bf16 %v777_v24, %v775_v43 }
 0x712   : > { %v899_v8 = vsel %vm527_vm2, %v892_v42, %v896_v45  ;;  %v901_v9 = vsel %vm527_vm2, %v896_v45, %v892_v42 }
 0x713   : > { %954 = vmatprep.subr.bf16.mxu1 %v780_v50  ;;  %v903_v10 = vmul.f32 %v899_v8, %v1524_v5  ;;  %v904_v11 = vmul.f32 %v901_v9, %v1527_v6 }
 0x714   : > { %955 = vmatpush1.bf16.msra.mxu1 %v779_v51 }
 0x715   : > { %v898_v34 = vpop.permute.xlu1 %897  ;;  %1109 = vmatprep.subr.msk.bf16.mxu1 %vm573_vm3, %v910_v3 }
 0x716   : > { %v900_v0 = vsel %vm527_vm2, %v894_v48, %v898_v34  ;;  %v902_v35 = vsel %vm527_vm2, %v898_v34, %v894_v48 }
 0x717   : > { %v905_v12 = vmul.f32 %v900_v0, %v1524_v5  ;;  %v906_v13 = vmul.f32 %v902_v35, %v1527_v6 }
 0x718   : > { %969 = vmatpush2.bf16.msra.mxu1 %v935_v14 }
 0x719   : > { %v908_v17 = vpack.c.bf16 %v906_v13, %v904_v11  ;;  %v907_v53 = vpack.c.bf16 %v905_v12, %v903_v10 }
 0x71b   : > { %970 = vmatprep.subr.bf16.mxu1 %v908_v17 }
 0x71c   : > { %971 = vmatpush2.bf16.msra.mxu1 %v907_v53 }
 0x71e   : > { %v915_v1 = vpop.permute.xlu0 %914 }
 0x71f   : > { %973 = vmatmul.mubr.bf16.vlgmr.msra.gmra.mxu1 %v1193_v61 }
 0x722   : > { %v919_v5 = vpop.permute.xlu1 %918 }
 0x7df   : > { %v974_v63 = vpop.f32.mrf.mxu1 }
 0x7e0   : > { %v975_v18 = vadd.f32 %v974_v63, %v915_v1 }
 0x7e1   : > { %v976_v54 = vpop.f32.mrf.mxu1 }
 0x7e2   : > { %983 = vst [vmem:[%s301_s20] sm:$0xff] %v975_v18  ;;  %v977_v6 = vadd.f32 %v976_v54, %v915_v1 }
 0x7e3   : > { %v978_v59 = vpop.f32.mrf.mxu1 }
 0x7e4   : > { %984 = vst [vmem:[%s301_s20 + $0x8] sm:$0xff] %v977_v6  ;;  %v979_v20 = vadd.f32 %v978_v59, %v919_v5 }
 0x7e5   : > { %v980_v57 = vpop.f32.mrf.mxu1 }
 0x7e6   : > { %985 = vst [vmem:[%s301_s20 + $0x10] sm:$0xff] %v979_v20  ;;  %v981_v58 = vadd.f32 %v980_v57, %v919_v5 }
 0x7e8   : > { %986 = vst [vmem:[%s301_s20 + $0x18] sm:$0xff] %v981_v58 }
 0x7e9   : > { %1265 = shalt.err (!%p1262_p0)
}
 0x7ea   : > { %s1266_s15 = scalar_lea.hbm %s1893_s21, 512  ;;  %s1270_s20 = scalar_lea.hbm %s1943_s7, 1024 }
 0x7eb   : > { %p1267_p1 = scmp.ne.s32.totalorder %s1893_s21, %s1266_s15  ;;  %p1271_p4 = scmp.lt.s32.totalorder %s1893_s21, %s1943_s7 }
 0x7ec   : > { %p1272_p7 = scmp.lt.s32.totalorder %s1270_s20, %s1266_s15 }
 0x7ed   : > { %p1268_p2 = pnand %p1267_p1, %p1414_p5 }
 0x7ee   : > { %p1273_p8 = por %p1272_p7, %p1271_p4 }
 0x7ef   : > { %p1269_p3 = pneg %p1268_p2 }
 0x7f1   : > { %p1274_p6 = pnand %p1273_p8, %p1269_p3 }
 0x7f3   : > { %1277 = shalt.err (!%p1274_p6)
}
 0x7f4   : > { %s1335_s14 = smov 256  }
 0x7f5   : > { %1123 = dma.vmem_to_hbm [thread:$0]  (%p1414_p5), %s1888_s23, 512, %s1893_s21, %s1895_s22, %s1335_s14, %s1335_s14, %s1331_s29  }
 0x7f6 PF: > { %p1135_p9 = scmp.ge.s32.totalorder %s1316_s27, 2  ;;  %s1016_s16 = sand.u32 1, %s1304_s24  }
 0x7f7   : > { %p1947_p10 = scmp.ne.s32.totalorder %s1945_s12, 0  ;;  %s1017_s28 = scalar_lea.sflag [#allocation4], %s1016_s16 }
 0x7f9   : > { %p1130_p11 = pnand %p1135_p9, %p1947_p10 }
 0x7fb   : > { %p1131_p12 = pneg %p1130_p11 }
 0x7fd   : > { %1299 = dma.done.wait (%p1131_p12), %s1017_s28, 512  }
 0x7fe   : > { %1301 = vsyncadd (%p1131_p12), %s1017_s28, 4294966784  ;;  %p18_p13 = scmp.ge.s32.totalorder %s1401_s30, 4   ;;  %s1948_s24 = smov %s1308_s25 }
 0x7ff   : > { %s1949_s25 = smov %s1312_s26  ;;  %s1950_s26 = smov %s1412_s10 }
 0x800   : > { %s1951_s27 = smov %s1401_s30  ;;  %20 = sbr.rel (!%p18_p13) target bundleno = 4 (0x4), region = 91 }
 0x805   :  { %1022 = vsyncpa [#allocation3], 1 }
 0x806   :  { %1024 = vsyncpa [#allocation3 + $0x1], 1 }
 0x807   :  { %1025 = vsyncpa [#allocation4], 1 }
 0x808   :  { %1027 = vsyncpa [#allocation4 + $0x1], 1 }

</bundles_post_ra>
